<compile_context>
chip_gen: v6e
topology: v6e:2x2x1
jax: 0.10.0
libtpu: 0.0.40
codegen_flags: <defaults>
</compile_context>

<pallas_src>
import functools

import jax
import jax.numpy as jnp
from jax.experimental import pallas as pl
from jax.experimental.pallas import tpu as pltpu


EMB_DIM = 128
_HIGHEST = jax.lax.Precision.HIGHEST


def _round_up(x, m):
    return ((x + m - 1) // m) * m


# ---------------------------------------------------------------------------
# Kernel
# ---------------------------------------------------------------------------
def dual_baseline_kernel(num_states, num_actions,
                         idx_ref,
                         w_fused_ref, b_hidden_ref,
                         w_heads_ref, b_heads_ref,
                         out_ref):
    """One grid step processes a (tile_b,) slice of the batch.

    idx_ref      : (tile_b, 8) int32 -- col 0: state idx
                                        col 1: action idx + NS
                                        col 2: next_state idx + 2*NS
                                        cols 3..7: padding (zeros)
    w_fused_ref  : (K, 2*EMB) f32    -- embedding tables folded into the three
                                        hidden projections, K = round_up(3*NS, 128)
    b_hidden_ref : (1, 2*EMB) f32    -- [b_s + b_a | b_s + b_ns]
    w_heads_ref  : (2*EMB, L) f32    -- state head lanes [0,NS), action head
                                        lanes [NS,NS+NA), L multiple of 128
    b_heads_ref  : (1, L) f32
    out_ref      : (tile_b, L) f32   -- lane-dense log-prob slab
    """
    ns, na = num_states, num_actions
    k_rows = w_fused_ref.shape[0]
    lanes = w_heads_ref.shape[1]

    # ---- fused embedding gather: build the one-hot LHS.  The three index
    # ranges [0,NS), [NS,2NS), [2NS,3NS) are disjoint (offsets pre-added in
    # the wrapper), so one OR'd compare yields exactly three ones per row.
    idx = idx_ref[...]                      # (tb, 8) int32
    s_idx = idx[:, 0:1]                     # (tb, 1)
    a_idx = idx[:, 1:2]
    n_idx = idx[:, 2:3]
    row_lane = jax.lax.broadcasted_iota(jnp.int32, (1, k_rows), 1)   # (1, K)
    onehot = ((row_lane == s_idx) | (row_lane == a_idx)
              | (row_lane == n_idx)).astype(jnp.float32)             # (tb, K)

    # ---- MXU call #1: gather + 3 hidden projections + the two adds.
    h = jnp.dot(onehot, w_fused_ref[...],
                preferred_element_type=jnp.float32) + b_hidden_ref[...]
    h = jnp.tanh(h)        # (tb, 2*EMB): [:, :EMB]=s_a_emb, [:, EMB:]=s_s_emb

    # ---- MXU call #2: both output heads in one lane-dense matmul.
    logits = jnp.dot(h, w_heads_ref[...],
                     preferred_element_type=jnp.float32) + b_heads_ref[...]

    # ---- masked log_softmax per head, single shared exp slab.
    lane = jax.lax.broadcasted_iota(jnp.int32, (1, lanes), 1)        # (1, L)
    is_state = lane < ns
    is_action = (lane >= ns) & (lane < ns + na)
    neg = jnp.float32(-1e30)

    m_s = jnp.max(jnp.where(is_state, logits, neg), axis=1, keepdims=True)
    m_a = jnp.max(jnp.where(is_action, logits, neg), axis=1, keepdims=True)

    m_comb = jnp.where(is_state, m_s, m_a)          # (tb, L)
    e = jnp.exp(logits - m_comb)                    # ONE exp over the slab
    sum_s = jnp.sum(jnp.where(is_state, e, 0.0), axis=1, keepdims=True)
    sum_a = jnp.sum(jnp.where(is_action, e, 0.0), axis=1, keepdims=True)
    lse_s = jnp.log(sum_s) + m_s
    lse_a = jnp.log(sum_a) + m_a

    out_ref[...] = jnp.where(is_state, logits - lse_s,
                             jnp.where(is_action, logits - lse_a,
                                       jnp.float32(0.0)))


# ---------------------------------------------------------------------------
# One-time weight folding (runs once per parameter set, outside the hot path)
# ---------------------------------------------------------------------------
def fuse_params(params, num_states, num_actions):
    """Fold the weights into the two fused kernel operands.

    Each embedding table is folded into its hidden projection (T @ W); the
    three results are stacked into one block RHS whose first 128 output lanes
    give h_s + h_a and last 128 give h_s + h_ns.  The two output heads are
    packed into one lane-dense (2*EMB, 128) matrix.  Mathematically identical
    to the original forward (one-hot row selection is exact).

    NOTE: the one-hot gather assumes num_states is modest (one-hot width is
    round_up(3*num_states, 128) lanes).  For a very large vocabulary keep the
    tables in HBM and gather rows with scalar-prefetch index maps instead.
    """
    ns, na, e = num_states, num_actions, EMB_DIM

    proj_s = jnp.dot(params["state_emb"], params["w_s"], precision=_HIGHEST)
    proj_a = jnp.dot(params["action_emb"], params["w_a"], precision=_HIGHEST)
    proj_n = jnp.dot(params["next_state_emb"], params["w_ns"], precision=_HIGHEST)

    # Full-lane K so MXU call #1 needs no masked/partial-lane handling.
    k_rows = _round_up(3 * ns, 128)
    w_fused = jnp.zeros((k_rows, 2 * e), jnp.float32)
    w_fused = w_fused.at[0:ns, 0:e].set(proj_s)
    w_fused = w_fused.at[0:ns, e:2 * e].set(proj_s)
    w_fused = w_fused.at[ns:2 * ns, 0:e].set(proj_a)
    w_fused = w_fused.at[2 * ns:3 * ns, e:2 * e].set(proj_n)

    b_hidden = jnp.concatenate(
        [params["b_s"] + params["b_a"], params["b_s"] + params["b_ns"]], axis=1)

    lanes = _round_up(ns + na, 128)
    w_heads = jnp.zeros((2 * e, lanes), jnp.float32)
    w_heads = w_heads.at[0:e, 0:ns].set(params["w_state_out"])
    w_heads = w_heads.at[e:2 * e, ns:ns + na].set(params["w_action_out"])

    b_heads = jnp.zeros((1, lanes), jnp.float32)
    b_heads = b_heads.at[:, 0:ns].set(params["b_state_out"])
    b_heads = b_heads.at[:, ns:ns + na].set(params["b_action_out"])

    return {"w_fused": w_fused, "b_hidden": b_hidden,
            "w_heads": w_heads, "b_heads": b_heads}


# ---------------------------------------------------------------------------
# Forward wrapper
# ---------------------------------------------------------------------------
@functools.partial(jax.jit, static_argnames=("num_states", "num_actions"))
def dual_baseline_forward(states, actions, next_states, fused,
                          *, num_states, num_actions):
    """Pallas implementation of DualBaseline.forward.

    states/actions/next_states : int index vectors of shape (B,)
    fused                      : output of fuse_params()
    returns (st_out (B, num_states), act_out (B, num_actions)) log-probs.
    """
    B = states.shape[0]
    lanes = fused["w_heads"].shape[1]
    assert num_states + num_actions <= lanes

    # Batch tiling: big tiles amortize the ~0.35 us/step pipeline overhead and
    # the repeated MXU weight pushes; for multi-tile batches keep >= 2 grid
    # steps so v7x's two TensorCores both get work (dimension_semantics
    # "parallel").  Weights stay VMEM-resident via index-constant specs.
    if B <= 256:
        tile_b = _round_up(B, 8)
    else:
        tile_b = min(2048, _round_up(-(-B // 2), 256))
    b_pad = _round_up(B, tile_b)
    grid = (b_pad // tile_b,)

    # Pack the three index vectors into ONE (b_pad, 8) int32 operand with the
    # per-table row offsets pre-added (cols 3..7 are padding).
    idx = jnp.stack(
        [states.astype(jnp.int32),
         actions.astype(jnp.int32) + num_states,
         next_states.astype(jnp.int32) + 2 * num_states],
        axis=1)                                            # (B, 3)
    idx = jnp.pad(idx, ((0, b_pad - B), (0, 8 - 3)))       # (b_pad, 8)

    idx_spec = pl.BlockSpec((tile_b, 8), lambda i: (i, 0))

    def const_spec(arr):
        return pl.BlockSpec(arr.shape, lambda i: (0, 0))

    # Only raise the scoped-VMEM limit when the big-tile working set needs it
    # (keeps v5e's 16 MiB default from binding without a blanket override).
    vmem_limit = 32 * 1024 * 1024 if tile_b >= 1024 else None

    out = pl.pallas_call(
        functools.partial(dual_baseline_kernel, num_states, num_actions),
        out_shape=jax.ShapeDtypeStruct((b_pad, lanes), jnp.float32),
        grid=grid,
        in_specs=[
            idx_spec,
            const_spec(fused["w_fused"]),
            const_spec(fused["b_hidden"]),
            const_spec(fused["w_heads"]),
            const_spec(fused["b_heads"]),
        ],
        out_specs=pl.BlockSpec((tile_b, lanes), lambda i: (i, 0)),
        compiler_params=pltpu.CompilerParams(
            dimension_semantics=("parallel",),
            vmem_limit_bytes=vmem_limit),
    )(idx,
      fused["w_fused"], fused["b_hidden"],
      fused["w_heads"], fused["b_heads"])

    st_out = out[:B, :num_states]
    act_out = out[:B, num_states:num_states + num_actions]
    return st_out, act_out


# ---------------------------------------------------------------------------
# Parameter init (mirrors the PyTorch module) + pure-JAX reference
# ---------------------------------------------------------------------------
def _normc(key, out_features, in_features):
    """init_normc_: N(0,1) then normalize each output row to unit norm.
    Returned pre-transposed to (in_features, out_features) for y = x @ W."""
    w = jax.random.normal(key, (out_features, in_features), dtype=jnp.float32)
    w = w / jnp.sqrt(jnp.sum(w * w, axis=1, keepdims=True))
    return w.T


def init_params(key, num_states, num_actions):
    keys = jax.random.split(key, 10)
    p = {}
    # nn.Embedding default init: N(0, 1).  All three embeddings have
    # num_states rows, matching the original module.
    p["state_emb"] = jax.random.normal(keys[0], (num_states, EMB_DIM), jnp.float32)
    p["action_emb"] = jax.random.normal(keys[1], (num_states, EMB_DIM), jnp.float32)
    p["next_state_emb"] = jax.random.normal(keys[2], (num_states, EMB_DIM), jnp.float32)
    p["w_s"] = _normc(keys[3], EMB_DIM, EMB_DIM)
    p["b_s"] = jnp.zeros((1, EMB_DIM), jnp.float32)
    p["w_a"] = _normc(keys[4], EMB_DIM, EMB_DIM)
    p["b_a"] = jnp.zeros((1, EMB_DIM), jnp.float32)
    p["w_ns"] = _normc(keys[5], EMB_DIM, EMB_DIM)
    p["b_ns"] = jnp.zeros((1, EMB_DIM), jnp.float32)
    p["w_state_out"] = _normc(keys[6], num_states, EMB_DIM)
    p["b_state_out"] = 0.01 * jax.random.normal(keys[7], (1, num_states), jnp.float32)
    p["w_action_out"] = _normc(keys[8], num_actions, EMB_DIM)
    p["b_action_out"] = 0.01 * jax.random.normal(keys[9], (1, num_actions), jnp.float32)
    return p


def reference_forward(states, actions, next_states, params):
    """Pure-JAX reference mirroring the PyTorch module."""
    st = jnp.take(params["state_emb"], states, axis=0)
    ac = jnp.take(params["action_emb"], actions, axis=0)
    ns = jnp.take(params["next_state_emb"], next_states, axis=0)
    h_s = jnp.dot(st, params["w_s"], precision=_HIGHEST) + params["b_s"]
    h_a = jnp.dot(ac, params["w_a"], precision=_HIGHEST) + params["b_a"]
    h_ns = jnp.dot(ns, params["w_ns"], precision=_HIGHEST) + params["b_ns"]
    s_a = jnp.tanh(h_s + h_a)
    s_s = jnp.tanh(h_s + h_ns)
    logits_s = jnp.dot(s_a, params["w_state_out"], precision=_HIGHEST) + params["b_state_out"]
    logits_a = jnp.dot(s_s, params["w_action_out"], precision=_HIGHEST) + params["b_action_out"]
    return jax.nn.log_softmax(logits_s, axis=1), jax.nn.log_softmax(logits_a, axis=1)


if __name__ == "__main__":
    NUM_STATES = 16
    NUM_ACTIONS = 4
    BATCH = 8

    key = jax.random.PRNGKey(0)
    k_params, k_s, k_a, k_ns = jax.random.split(key, 4)

    params = init_params(k_params, NUM_STATES, NUM_ACTIONS)
    states = jax.random.randint(k_s, (BATCH,), 0, NUM_STATES, dtype=jnp.int32)
    actions = jax.random.randint(k_a, (BATCH,), 0, NUM_STATES, dtype=jnp.int32)
    next_states = jax.random.randint(k_ns, (BATCH,), 0, NUM_STATES, dtype=jnp.int32)

    fused = fuse_params(params, NUM_STATES, NUM_ACTIONS)   # one-time weight fold

    st_out, act_out = dual_baseline_forward(
        states, actions, next_states, fused,
        num_states=NUM_STATES, num_actions=NUM_ACTIONS,
    )
    jax.block_until_ready((st_out, act_out))

    st_ref, act_ref = reference_forward(states, actions, next_states, params)
    assert st_out.shape == (BATCH, NUM_STATES)
    assert act_out.shape == (BATCH, NUM_ACTIONS)
    assert jnp.allclose(st_out, st_ref, atol=1e-4, rtol=1e-4)
    assert jnp.allclose(act_out, act_ref, atol=1e-4, rtol=1e-4)

    print("KERNEL_OK")
</pallas_src>

<mosaic_0001>
module attributes {stable_mosaic.version = 11 : i64} {
  func.func @dual_baseline_kernel(%arg0: i32, %arg1: memref<8x8xi32, #tpu.memory_space<vmem>>, %arg2: memref<128x256xf32, #tpu.memory_space<vmem>>, %arg3: memref<1x256xf32, #tpu.memory_space<vmem>>, %arg4: memref<256x128xf32, #tpu.memory_space<vmem>>, %arg5: memref<1x128xf32, #tpu.memory_space<vmem>>, %arg6: memref<8x128xf32, #tpu.memory_space<vmem>>) attributes {dimension_semantics = [#tpu.dimension_semantics<parallel>], iteration_bounds = array<i64: 1>, scalar_prefetch = 0 : i64, scratch_operands = 0 : i64, tpu.core_type = #tpu.core_type<tc>, window_params = [{transform_indices = @transform_0, window_bounds = array<i64: 8, 8>}, {pipeline_mode = #tpu.pipeline_mode<synchronous>, transform_indices = @transform_1, window_bounds = array<i64: 128, 256>}, {pipeline_mode = #tpu.pipeline_mode<synchronous>, transform_indices = @transform_2, window_bounds = array<i64: 1, 256>}, {pipeline_mode = #tpu.pipeline_mode<synchronous>, transform_indices = @transform_3, window_bounds = array<i64: 256, 128>}, {pipeline_mode = #tpu.pipeline_mode<synchronous>, transform_indices = @transform_4, window_bounds = array<i64: 1, 128>}, {transform_indices = @transform_5, window_bounds = array<i64: 8, 128>}]} {
    %c0 = arith.constant 0 : index
    %c0_0 = arith.constant 0 : index
    %0 = vector.load %arg1[%c0, %c0_0] : memref<8x8xi32, #tpu.memory_space<vmem>>, vector<8x8xi32>
    %1 = vector.extract_strided_slice %0 {offsets = [0, 0], sizes = [8, 1], strides = [1, 1]} : vector<8x8xi32> to vector<8x1xi32>
    %2 = vector.extract_strided_slice %0 {offsets = [0, 1], sizes = [8, 1], strides = [1, 1]} : vector<8x8xi32> to vector<8x1xi32>
    %3 = vector.extract_strided_slice %0 {offsets = [0, 2], sizes = [8, 1], strides = [1, 1]} : vector<8x8xi32> to vector<8x1xi32>
    %4 = tpu.iota {dimensions = array<i32: 1>} : vector<1x128xi32>
    %5 = vector.broadcast %4 : vector<1x128xi32> to vector<8x128xi32>
    %6 = vector.broadcast %1 : vector<8x1xi32> to vector<8x128xi32>
    %7 = arith.cmpi eq, %5, %6 : vector<8x128xi32>
    %8 = vector.broadcast %4 : vector<1x128xi32> to vector<8x128xi32>
    %9 = vector.broadcast %2 : vector<8x1xi32> to vector<8x128xi32>
    %10 = arith.cmpi eq, %8, %9 : vector<8x128xi32>
    %11 = arith.ori %7, %10 : vector<8x128xi1>
    %12 = vector.broadcast %4 : vector<1x128xi32> to vector<8x128xi32>
    %13 = vector.broadcast %3 : vector<8x1xi32> to vector<8x128xi32>
    %14 = arith.cmpi eq, %12, %13 : vector<8x128xi32>
    %15 = arith.ori %11, %14 : vector<8x128xi1>
    %16 = arith.extui %15 : vector<8x128xi1> to vector<8x128xi32>
    %17 = arith.sitofp %16 : vector<8x128xi32> to vector<8x128xf32>
    %c0_1 = arith.constant 0 : index
    %c0_2 = arith.constant 0 : index
    %18 = vector.load %arg2[%c0_1, %c0_2] : memref<128x256xf32, #tpu.memory_space<vmem>>, vector<128x256xf32>
    %cst = arith.constant dense<0.000000e+00> : vector<8x256xf32>
    %19 = tpu.matmul %17, %18, %cst {dimension_numbers = #tpu.dot_dimension_numbers<[1], [0], [0], [1], [0, 0, 1, 1], [], []>} : vector<8x128xf32>, vector<128x256xf32>, vector<8x256xf32> -> vector<8x256xf32>
    %c0_3 = arith.constant 0 : index
    %c0_4 = arith.constant 0 : index
    %20 = vector.load %arg3[%c0_3, %c0_4] : memref<1x256xf32, #tpu.memory_space<vmem>>, vector<1x256xf32>
    %21 = vector.broadcast %20 : vector<1x256xf32> to vector<8x256xf32>
    %22 = arith.addf %19, %21 : vector<8x256xf32>
    %23 = math.tanh %22 : vector<8x256xf32>
    %c0_5 = arith.constant 0 : index
    %c0_6 = arith.constant 0 : index
    %24 = vector.load %arg4[%c0_5, %c0_6] : memref<256x128xf32, #tpu.memory_space<vmem>>, vector<256x128xf32>
    %cst_7 = arith.constant dense<0.000000e+00> : vector<8x128xf32>
    %25 = tpu.matmul %23, %24, %cst_7 {dimension_numbers = #tpu.dot_dimension_numbers<[1], [0], [0], [1], [0, 0, 1, 1], [], []>} : vector<8x256xf32>, vector<256x128xf32>, vector<8x128xf32> -> vector<8x128xf32>
    %c0_8 = arith.constant 0 : index
    %c0_9 = arith.constant 0 : index
    %26 = vector.load %arg5[%c0_8, %c0_9] : memref<1x128xf32, #tpu.memory_space<vmem>>, vector<1x128xf32>
    %27 = vector.broadcast %26 : vector<1x128xf32> to vector<8x128xf32>
    %28 = arith.addf %25, %27 : vector<8x128xf32>
    %29 = tpu.iota {dimensions = array<i32: 1>} : vector<1x128xi32>
    %c16_i32 = arith.constant 16 : i32
    %30 = vector.broadcast %c16_i32 : i32 to vector<1x128xi32>
    %31 = arith.cmpi slt, %29, %30 : vector<1x128xi32>
    %c16_i32_10 = arith.constant 16 : i32
    %32 = vector.broadcast %c16_i32_10 : i32 to vector<1x128xi32>
    %33 = arith.cmpi sge, %29, %32 : vector<1x128xi32>
    %c20_i32 = arith.constant 20 : i32
    %34 = vector.broadcast %c20_i32 : i32 to vector<1x128xi32>
    %35 = arith.cmpi slt, %29, %34 : vector<1x128xi32>
    %36 = arith.andi %33, %35 : vector<1x128xi1>
    %cst_11 = arith.constant -1.000000e+30 : f32
    %37 = vector.shape_cast %31 : vector<1x128xi1> to vector<1x128xi1>
    %38 = vector.broadcast %37 : vector<1x128xi1> to vector<8x128xi1>
    %39 = vector.broadcast %cst_11 : f32 to vector<8x128xf32>
    %40 = arith.select %38, %28, %39 : vector<8x128xi1>, vector<8x128xf32>
    %cst_12 = arith.constant dense<0xFF800000> : vector<8xf32>
    %41 = vector.multi_reduction <maximumf>, %40, %cst_12 [1] : vector<8x128xf32> to vector<8xf32>
    %42 = vector.shape_cast %41 : vector<8xf32> to vector<8x1xf32>
    %cst_13 = arith.constant -1.000000e+30 : f32
    %43 = vector.shape_cast %36 : vector<1x128xi1> to vector<1x128xi1>
    %44 = vector.broadcast %43 : vector<1x128xi1> to vector<8x128xi1>
    %45 = vector.broadcast %cst_13 : f32 to vector<8x128xf32>
    %46 = arith.select %44, %28, %45 : vector<8x128xi1>, vector<8x128xf32>
    %cst_14 = arith.constant dense<0xFF800000> : vector<8xf32>
    %47 = vector.multi_reduction <maximumf>, %46, %cst_14 [1] : vector<8x128xf32> to vector<8xf32>
    %48 = vector.shape_cast %47 : vector<8xf32> to vector<8x1xf32>
    %49 = vector.shape_cast %31 : vector<1x128xi1> to vector<1x128xi1>
    %50 = vector.broadcast %49 : vector<1x128xi1> to vector<8x128xi1>
    %51 = vector.shape_cast %42 : vector<8x1xf32> to vector<8x1xf32>
    %52 = vector.broadcast %51 : vector<8x1xf32> to vector<8x128xf32>
    %53 = vector.shape_cast %48 : vector<8x1xf32> to vector<8x1xf32>
    %54 = vector.broadcast %53 : vector<8x1xf32> to vector<8x128xf32>
    %55 = arith.select %50, %52, %54 : vector<8x128xi1>, vector<8x128xf32>
    %56 = arith.subf %28, %55 : vector<8x128xf32>
    %57 = math.exp %56 : vector<8x128xf32>
    %cst_15 = arith.constant 0.000000e+00 : f32
    %58 = vector.shape_cast %31 : vector<1x128xi1> to vector<1x128xi1>
    %59 = vector.broadcast %58 : vector<1x128xi1> to vector<8x128xi1>
    %60 = vector.broadcast %cst_15 : f32 to vector<8x128xf32>
    %61 = arith.select %59, %57, %60 : vector<8x128xi1>, vector<8x128xf32>
    %cst_16 = arith.constant dense<0.000000e+00> : vector<8xf32>
    %62 = vector.multi_reduction <add>, %61, %cst_16 [1] : vector<8x128xf32> to vector<8xf32>
    %63 = vector.shape_cast %62 : vector<8xf32> to vector<8x1xf32>
    %cst_17 = arith.constant 0.000000e+00 : f32
    %64 = vector.shape_cast %36 : vector<1x128xi1> to vector<1x128xi1>
    %65 = vector.broadcast %64 : vector<1x128xi1> to vector<8x128xi1>
    %66 = vector.broadcast %cst_17 : f32 to vector<8x128xf32>
    %67 = arith.select %65, %57, %66 : vector<8x128xi1>, vector<8x128xf32>
    %cst_18 = arith.constant dense<0.000000e+00> : vector<8xf32>
    %68 = vector.multi_reduction <add>, %67, %cst_18 [1] : vector<8x128xf32> to vector<8xf32>
    %69 = vector.shape_cast %68 : vector<8xf32> to vector<8x1xf32>
    %70 = math.log %63 : vector<8x1xf32>
    %71 = arith.addf %70, %42 : vector<8x1xf32>
    %72 = math.log %69 : vector<8x1xf32>
    %73 = arith.addf %72, %48 : vector<8x1xf32>
    %74 = vector.broadcast %71 : vector<8x1xf32> to vector<8x128xf32>
    %75 = arith.subf %28, %74 : vector<8x128xf32>
    %76 = vector.broadcast %73 : vector<8x1xf32> to vector<8x128xf32>
    %77 = arith.subf %28, %76 : vector<8x128xf32>
    %cst_19 = arith.constant 0.000000e+00 : f32
    %78 = vector.shape_cast %36 : vector<1x128xi1> to vector<1x128xi1>
    %79 = vector.broadcast %78 : vector<1x128xi1> to vector<8x128xi1>
    %80 = vector.broadcast %cst_19 : f32 to vector<8x128xf32>
    %81 = arith.select %79, %77, %80 : vector<8x128xi1>, vector<8x128xf32>
    %82 = vector.shape_cast %31 : vector<1x128xi1> to vector<1x128xi1>
    %83 = vector.broadcast %82 : vector<1x128xi1> to vector<8x128xi1>
    %84 = arith.select %83, %75, %81 : vector<8x128xi1>, vector<8x128xf32>
    %c0_20 = arith.constant 0 : index
    %c0_21 = arith.constant 0 : index
    %85 = vector.load %arg6[%c0_20, %c0_21] : memref<8x128xf32, #tpu.memory_space<vmem>>, vector<8x128xf32>
    tpu.vector_store %arg6[%c0_20, %c0_21], %84 {strides = array<i32>} : memref<8x128xf32, #tpu.memory_space<vmem>>, vector<8x128xf32>,
    return
  }
  func.func @transform_0(%arg0: i32) -> (i32, i32) {
    %c0_i32 = arith.constant 0 : i32
    %c0_i32_0 = arith.constant 0 : i32
    return %arg0, %c0_i32 : i32, i32
  }
  func.func @transform_1(%arg0: i32) -> (i32, i32) {
    %c0_i32 = arith.constant 0 : i32
    %c0_i32_0 = arith.constant 0 : i32
    %c0_i32_1 = arith.constant 0 : i32
    return %c0_i32, %c0_i32_0 : i32, i32
  }
  func.func @transform_2(%arg0: i32) -> (i32, i32) {
    %c0_i32 = arith.constant 0 : i32
    %c0_i32_0 = arith.constant 0 : i32
    %c0_i32_1 = arith.constant 0 : i32
    return %c0_i32, %c0_i32_0 : i32, i32
  }
  func.func @transform_3(%arg0: i32) -> (i32, i32) {
    %c0_i32 = arith.constant 0 : i32
    %c0_i32_0 = arith.constant 0 : i32
    %c0_i32_1 = arith.constant 0 : i32
    return %c0_i32, %c0_i32_0 : i32, i32
  }
  func.func @transform_4(%arg0: i32) -> (i32, i32) {
    %c0_i32 = arith.constant 0 : i32
    %c0_i32_0 = arith.constant 0 : i32
    %c0_i32_1 = arith.constant 0 : i32
    return %c0_i32, %c0_i32_0 : i32, i32
  }
  func.func @transform_5(%arg0: i32) -> (i32, i32) {
    %c0_i32 = arith.constant 0 : i32
    %c0_i32_0 = arith.constant 0 : i32
    return %arg0, %c0_i32 : i32, i32
  }
}

</mosaic_0001>

<bundles_post_ra>
// kernel: dual_baseline_forward.1
= control target key start
LH: loop header
LB: loop body
LE: loop exit
PB: predicated region body
PF: predicated region fallthrough
CT: control target
= control target key end

     0   :  { %10 = vsyncpa [#allocation3], 0  ;;  %s526_s0 = inlined_call_operand.vmem [shape: s32[8,8], index: 0, kind: input, shape index: {}]   ;;  %s527_s1 = inlined_call_operand.hbm [shape: f32[128,256], index: 1, kind: input, shape index: {}]   ;;  %s528_s2 = inlined_call_operand.vmem [shape: f32[1,256], index: 2, kind: input, shape index: {}]   ;;  %s529_s3 = inlined_call_operand.hbm [shape: f32[256,128], index: 3, kind: input, shape index: {}]   ;;  %s530_s4 = inlined_call_operand.vmem [shape: f32[1,128], index: 4, kind: input, shape index: {}]   ;;  %s531_s5 = inlined_call_operand.vmem [shape: f32[8,128], index: 5, kind: output, shape index: {}]  }
   0x1   :  { %11 = vsyncpa [#allocation5], 0  ;;  %s441_s18 = smov [#allocation2]  }
   0x2   :  { %s19_s19 = sshll.u32 %s441_s18, 4  ;;  %s20_s19 = int_to_ptr.vmem [resolvable:$true] %s19_s19 }
   0x3   :  { %s405_s20 = scalar_lea.vmem %s20_s19, 4096  ;;  %p410_p1 = scmp.lt.s32.totalorder %s20_s19, %s20_s19 }
   0x4   :  { %p406_p0 = scmp.ne.s32.totalorder %s20_s19, %s405_s20  ;;  %p411_p2 = scmp.lt.s32.totalorder %s405_s20, %s405_s20 }
   0x6   :  { %p412_p3 = por %p411_p2, %p410_p1 }
   0x8   :  { %p413_p4 = pnand %p412_p3, %p406_p0 }
   0xa   :  { %416 = shalt.err (!%p413_p4)
}
   0xb   :  { %s442_s21 = smov 256   ;;  %s443_s22 = smov 16  }
   0xc   :  { %25 = dma.hbm_to_vmem [thread:$0]  %s527_s1, 4096, %s20_s19, [#allocation3], %s442_s21, %s442_s21, %s443_s22  }
   0xd   :  { %s444_s25 = smov [#allocation4]  }
   0xe   :  { %s33_s26 = sshll.u32 %s444_s25, 4  ;;  %s34_s26 = int_to_ptr.vmem [resolvable:$true] %s33_s26 }
   0xf   :  { %s425_s27 = scalar_lea.vmem %s34_s26, 4096  ;;  %p430_p6 = scmp.lt.s32.totalorder %s34_s26, %s34_s26 }
  0x10   :  { %p426_p5 = scmp.ne.s32.totalorder %s34_s26, %s425_s27  ;;  %p431_p7 = scmp.lt.s32.totalorder %s425_s27, %s425_s27 }
  0x12   :  { %p432_p8 = por %p431_p7, %p430_p6 }
  0x14   :  { %p433_p9 = pnand %p432_p8, %p426_p5 }
  0x16   :  { %436 = shalt.err (!%p433_p9)
}
  0x17   :  { %s445_s28 = smov 128   ;;  %s446_s29 = smov 8  }
  0x18   :  { %39 = dma.hbm_to_vmem [thread:$0]  %s529_s3, 4096, %s34_s26, [#allocation5], %s445_s28, %s445_s28, %s446_s29  }
  0x19   :  { %437 = dma.done.wait [#allocation3], 4096  }
  0x1a   :  { %438 = vsyncadd [#allocation3], 4294963200 }
  0x1b   :  { %439 = dma.done.wait [#allocation5], 4096  }
  0x1c   :  { %440 = vsyncadd [#allocation5], 4294963200  ;;  %v447_v0 = vmov 0   ;;  %v448_v1 = vmov 2   ;;  %v48_v2 = vld [vmem:[%s526_s0] sm:$0xff]  ;;  %v98_v3 = vld [vmem:[#allocation2 + $0xf8] sm:$0xff]  ;;  %v49_v49 = vlaneseq }
  0x1d   :  { %383 = vset.pattern.permute.xlu0 %v447_v0  ;;  %385 = vset.pattern.permute.xlu1 %v448_v1  ;;  %v97_v4 = vld [vmem:[#allocation2 + $0xf0] sm:$0xff]  ;;  %v96_v5 = vld [vmem:[#allocation2 + $0xe8] sm:$0xff]  ;;  %v95_v6 = vld [vmem:[#allocation2 + $0xe0] sm:$0xff]  ;;  %v449_v9 = vmov 0.0   ;;  %v450_v10 = vmov 1   ;;  %v451_v54 = vmov 1.0  }
  0x1e   :  { %52 = vperm.xlu0 %383, %v48_v2   ;;  %61 = vperm.xlu1 %385, %v48_v2   ;;  %v94_v7 = vld [vmem:[#allocation2 + $0xd8] sm:$0xff]  ;;  %v93_v8 = vld [vmem:[#allocation2 + $0xd0] sm:$0xff]  ;;  %v92_v11 = vld [vmem:[#allocation2 + $0xc8] sm:$0xff]  ;;  %v491_v51 = vand.u32 127, %v49_v49 }
  0x1f   :  { %111 = vmatprep.subr.mxu0 %v98_v3  ;;  %175 = vmatprep.mubr.f32.mxu0 %v449_v9  ;;  %v91_v12 = vld [vmem:[#allocation2 + $0xc0] sm:$0xff]  ;;  %v90_v13 = vld [vmem:[#allocation2 + $0xb8] sm:$0xff]  ;;  %v89_v14 = vld [vmem:[#allocation2 + $0xb0] sm:$0xff] }
  0x20   :  { %112 = vmatpush1.msra.mxu0 %v97_v4  ;;  %v88_v15 = vld [vmem:[#allocation2 + $0xa8] sm:$0xff]  ;;  %v87_v16 = vld [vmem:[#allocation2 + $0xa0] sm:$0xff]  ;;  %v86_v17 = vld [vmem:[#allocation2 + $0x98] sm:$0xff]  ;;  %vm294_vm5 = vcmp.ge.s32.totalorder %v491_v51, 16  ;;  %vm295_vm6 = vcmp.lt.s32.totalorder %v491_v51, 20  ;;  %vm293_vm8 = vcmp.lt.s32.totalorder %v491_v51, 16 }
  0x21   :  { %113 = vmatprep.subr.mxu0 %v96_v5  ;;  %v215_v18 = vld [vmem:[#allocation4 + $0xf8] sm:$0xff]  ;;  %v214_v20 = vld [vmem:[#allocation4 + $0xf0] sm:$0xff]  ;;  %v84_v23 = vld [vmem:[#allocation2 + $0x88] sm:$0xff] }
  0x22   :  { %384 = vset.pattern.permute.xlu0 %v450_v10  ;;  %114 = vmatpush1.msra.mxu0 %v95_v6  ;;  %v199_v19 = vld [vmem:[#allocation4 + $0x78] sm:$0xff]  ;;  %v85_v21 = vld [vmem:[#allocation2 + $0x90] sm:$0xff]  ;;  %v213_v24 = vld [vmem:[#allocation4 + $0xe8] sm:$0xff] }
  0x23   :  { %56 = vperm.xlu0 %384, %v48_v2   ;;  %115 = vmatprep.subr.mxu0 %v94_v7  ;;  %v198_v22 = vld [vmem:[#allocation4 + $0x70] sm:$0xff]  ;;  %v83_v25 = vld [vmem:[#allocation2 + $0x80] sm:$0xff]  ;;  %v197_v26 = vld [vmem:[#allocation4 + $0x68] sm:$0xff] }
  0x24   :  { %116 = vmatpush1.msra.mxu0 %v93_v8  ;;  %337 = vmatprep.subr.mxu1 %v215_v18  ;;  %v82_v27 = vld [vmem:[#allocation2 + $0x78] sm:$0xff]  ;;  %v212_v28 = vld [vmem:[#allocation4 + $0xe0] sm:$0xff]  ;;  %v81_v29 = vld [vmem:[#allocation2 + $0x70] sm:$0xff] }
  0x25   :  { %117 = vmatprep.subr.mxu0 %v92_v11  ;;  %338 = vmatpush3.msra.mxu1 %v199_v19  ;;  %v196_v30 = vld [vmem:[#allocation4 + $0x60] sm:$0xff]  ;;  %v80_v31 = vld [vmem:[#allocation2 + $0x68] sm:$0xff]  ;;  %v211_v32 = vld [vmem:[#allocation4 + $0xd8] sm:$0xff]  ;;  %v102_v11 = vshrl.u32 %v49_v49, 7 }
  0x26   :  { %118 = vmatpush1.msra.mxu0 %v91_v12  ;;  %339 = vmatprep.subr.mxu1 %v214_v20  ;;  %v79_v33 = vld [vmem:[#allocation2 + $0x60] sm:$0xff]  ;;  %v195_v34 = vld [vmem:[#allocation4 + $0x58] sm:$0xff]  ;;  %v210_v36 = vld [vmem:[#allocation4 + $0xd0] sm:$0xff] }
  0x27   :  { %119 = vmatprep.subr.mxu0 %v90_v13  ;;  %386 = vset.pattern.permute.xlu0 %v448_v1  ;;  %v78_v35 = vld [vmem:[#allocation2 + $0x58] sm:$0xff]  ;;  %v77_v37 = vld [vmem:[#allocation2 + $0x50] sm:$0xff]  ;;  %v76_v39 = vld [vmem:[#allocation2 + $0x48] sm:$0xff]  ;;  %v103_v12 = vsub.s32 0, %v102_v11 }
  0x28   :  { %120 = vmatpush1.msra.mxu0 %v89_v14  ;;  %340 = vmatpush3.msra.mxu1 %v198_v22  ;;  %v194_v38 = vld [vmem:[#allocation4 + $0x50] sm:$0xff]  ;;  %v75_v40 = vld [vmem:[#allocation2 + $0x40] sm:$0xff]  ;;  %v74_v41 = vld [vmem:[#allocation2 + $0x38] sm:$0xff]  ;;  %v107_v14 = vsub.s32 1, %v102_v11 }
  0x29   :  { %121 = vmatprep.subr.mxu0 %v88_v15  ;;  %341 = vmatprep.subr.mxu1 %v213_v24  ;;  %v73_v42 = vld [vmem:[#allocation2 + $0x30] sm:$0xff]  ;;  %v72_v43 = vld [vmem:[#allocation2 + $0x28] sm:$0xff]  ;;  %v71_v44 = vld [vmem:[#allocation2 + $0x20] sm:$0xff] }
  0x2a   :  { %122 = vmatpush1.msra.mxu0 %v87_v16  ;;  %342 = vmatpush3.msra.mxu1 %v197_v26  ;;  %v70_v45 = vld [vmem:[#allocation2 + $0x18] sm:$0xff]  ;;  %v69_v46 = vld [vmem:[#allocation2 + $0x10] sm:$0xff]  ;;  %v68_v47 = vld [vmem:[#allocation2 + $0x8] sm:$0xff] }
  0x2b   :  { %123 = vmatprep.subr.mxu0 %v86_v17  ;;  %343 = vmatprep.subr.mxu1 %v212_v28  ;;  %v67_v48 = vld [vmem:[#allocation2] sm:$0xff]  ;;  %v209_v55 = vld [vmem:[#allocation4 + $0xc8] sm:$0xff]  ;;  %v207_v59 = vld [vmem:[#allocation4 + $0xb8] sm:$0xff] }
  0x2c   :  { %124 = vmatpush1.msra.mxu0 %v85_v21  ;;  %344 = vmatpush3.msra.mxu1 %v196_v30  ;;  %v193_v56 = vld [vmem:[#allocation4 + $0x48] sm:$0xff]  ;;  %v208_v57 = vld [vmem:[#allocation4 + $0xc0] sm:$0xff]  ;;  %v191_v60 = vld [vmem:[#allocation4 + $0x38] sm:$0xff] }
  0x2d   :  { %125 = vmatprep.subr.mxu0 %v84_v23  ;;  %345 = vmatprep.subr.mxu1 %v211_v32  ;;  %v192_v58 = vld [vmem:[#allocation4 + $0x40] sm:$0xff]  ;;  %v206_v61 = vld [vmem:[#allocation4 + $0xb0] sm:$0xff]  ;;  %v205_v63 = vld [vmem:[#allocation4 + $0xa8] sm:$0xff] }
  0x2e   :  { %126 = vmatpush1.msra.mxu0 %v83_v25  ;;  %346 = vmatpush3.msra.mxu1 %v195_v34  ;;  %v190_v62 = vld [vmem:[#allocation4 + $0x30] sm:$0xff]  ;;  %v189_v0 = vld [vmem:[#allocation4 + $0x28] sm:$0xff]  ;;  %v204_v1 = vld [vmem:[#allocation4 + $0xa0] sm:$0xff] }
  0x2f   :  { %127 = vmatprep.subr.mxu0 %v82_v27  ;;  %347 = vmatprep.subr.mxu1 %v210_v36  ;;  %v188_v2 = vld [vmem:[#allocation4 + $0x20] sm:$0xff]  ;;  %v203_v3 = vld [vmem:[#allocation4 + $0x98] sm:$0xff]  ;;  %v202_v5 = vld [vmem:[#allocation4 + $0x90] sm:$0xff] }
  0x30   :  { %128 = vmatpush1.msra.mxu0 %v81_v29  ;;  %348 = vmatpush3.msra.mxu1 %v194_v38  ;;  %v187_v4 = vld [vmem:[#allocation4 + $0x18] sm:$0xff]  ;;  %v186_v6 = vld [vmem:[#allocation4 + $0x10] sm:$0xff]  ;;  %v201_v7 = vld [vmem:[#allocation4 + $0x88] sm:$0xff] }
  0x31   :  { %129 = vmatprep.subr.mxu0 %v80_v31  ;;  %349 = vmatprep.subr.mxu1 %v209_v55  ;;  %v185_v8 = vld [vmem:[#allocation4 + $0x8] sm:$0xff]  ;;  %v200_v9 = vld [vmem:[#allocation4 + $0x80] sm:$0xff]  ;;  %vm504_vm7 = vmand %vm294_vm5, %vm295_vm6 }
  0x32   :  { %130 = vmatpush1.msra.mxu0 %v79_v33  ;;  %350 = vmatpush3.msra.mxu1 %v193_v56  ;;  %v184_v10 = vld [vmem:[#allocation4] sm:$0xff] }
  0x33   :  { %131 = vmatprep.subr.mxu0 %v78_v35  ;;  %351 = vmatprep.subr.mxu1 %v208_v57  ;;  %v99_v13 = vld [vmem:[%s528_s2] sm:$0x3] }
  0x34   :  { %132 = vmatpush1.msra.mxu0 %v77_v37  ;;  %352 = vmatpush3.msra.mxu1 %v192_v58  ;;  %v104_v15 = vrot.slane %v99_v13, %v103_v12  ;;  %v108_v16 = vrot.slane %v99_v13, %v107_v14  ;;  %v336_v24 = vld [vmem:[%s530_s4] ss:$0 sm:$0xff] }
  0x35   :  { %133 = vmatprep.subr.mxu0 %v76_v39  ;;  %353 = vmatprep.subr.mxu1 %v207_v59 }
  0x36   :  { %134 = vmatpush1.msra.mxu0 %v75_v40  ;;  %354 = vmatpush3.msra.mxu1 %v191_v60 }
  0x37   :  { %135 = vmatprep.subr.mxu0 %v74_v41  ;;  %355 = vmatprep.subr.mxu1 %v206_v61 }
  0x38   :  { %136 = vmatpush1.msra.mxu0 %v73_v42  ;;  %356 = vmatpush3.msra.mxu1 %v190_v62 }
  0x39   :  { %137 = vmatprep.subr.mxu0 %v72_v43  ;;  %357 = vmatprep.subr.mxu1 %v205_v63 }
  0x3a   :  { %138 = vmatpush1.msra.mxu0 %v71_v44  ;;  %358 = vmatpush3.msra.mxu1 %v189_v0 }
  0x3b   :  { %139 = vmatprep.subr.mxu0 %v70_v45  ;;  %359 = vmatprep.subr.mxu1 %v204_v1 }
  0x3c   :  { %140 = vmatpush1.msra.mxu0 %v69_v46  ;;  %360 = vmatpush3.msra.mxu1 %v188_v2 }
  0x3d   :  { %141 = vmatprep.subr.mxu0 %v68_v47  ;;  %361 = vmatprep.subr.mxu1 %v203_v3 }
  0x3e   :  { %142 = vmatpush1.msra.mxu0 %v67_v48  ;;  %362 = vmatpush3.msra.mxu1 %v187_v4 }
  0x3f   :  { %363 = vmatprep.subr.mxu1 %v202_v5 }
  0x40   :  { %364 = vmatpush3.msra.mxu1 %v186_v6 }
  0x41   :  { %365 = vmatprep.subr.mxu1 %v201_v7 }
  0x42   :  { %366 = vmatpush3.msra.mxu1 %v185_v8 }
  0x43   :  { %367 = vmatprep.subr.mxu1 %v200_v9 }
  0x44   :  { %368 = vmatpush3.msra.mxu1 %v184_v10 }
  0x99   :  { %v53_v50 = vpop.permute.xlu0 %52  ;;  %v62_v52 = vpop.permute.xlu1 %61 }
  0x9a   :  { %vm63_vm0 = vcmp.eq.s32.totalorder %v491_v51, %v62_v52  ;;  %vm54_vm1 = vcmp.eq.s32.totalorder %v491_v51, %v53_v50 }
  0x9e   :  { %v57_v53 = vpop.permute.xlu0 %56 }
  0x9f   :  { %vm58_vm2 = vcmp.eq.s32.totalorder %v491_v51, %v57_v53 }
  0xa0   :  { %vm59_vm3 = vmor %vm54_vm1, %vm58_vm2 }
  0xa1   :  { %vm64_vm4 = vmor %vm59_vm3, %vm63_vm0 }
  0xa2   :  { %335 = vmatmul.mubr.msk.f32.vlgmr.msra.gmra.mxu0 %vm64_vm4, %v451_v54 }
 0x162   :  { %v177_v17 = vpop.f32.mrf.mxu0 }
 0x163   :  { %v178_v18 = vadd.f32 %v177_v17, %v104_v15 }
 0x164   :  { %v179_v19 = vpop.f32.mrf.mxu0 }
 0x165   :  { %v180_v20 = vadd.f32 %v179_v19, %v108_v16 }
 0x167   :  { %387 = vtanh.f32 %v180_v20 }
 0x168   :  { %389 = vtanh.f32 %v178_v18 }
 0x174   :  { %v388_v21 = vpop.eup %387 }
 0x175   :  { %v390_v22 = vpop.eup %389  ;;  %287 = vmatprep.mubr.f32.mxu1 %v388_v21 }
 0x176   :  { %288 = vmatmul.mubr.f32.vlgmr.msra.gmra.mxu1 %v390_v22 }
 0x236   :  { %v369_v23 = vpop.f32.mrf.mxu1 }
 0x238   :  { %v370_v25 = vpop.f32.mrf.mxu1 }
 0x239   :  { %v371_v26 = vadd.f32 %v370_v25, %v369_v23 }
 0x23b   :  { %v290_v28 = vadd.f32 %v371_v26, %v336_v24 }
 0x23d   :  { %v304_v29 = vsel %vm504_vm7, %v290_v28, -1e+30  ;;  %v299_v30 = vsel %vm293_vm8, %v290_v28, -1e+30 }
 0x23e   :  { %305 = vmax.xlane.f32.xlu0 %v304_v29  ;;  %300 = vmax.xlane.f32.xlu1 %v299_v30 }
 0x2c7   :  { %v306_v31 = vpop.xlane.xlu0 %305  ;;  %v301_v32 = vpop.xlane.xlu1 %300 }
 0x2c8   :  { %v307_v33 = vsel %vm293_vm8, %v301_v32, %v306_v31 }
 0x2c9   :  { %v308_v34 = vsub.f32 %v290_v28, %v307_v33 }
 0x2cb   :  { %v309_v35 = vmul.f32 1.442695, %v308_v34 }
 0x2cd   :  { %391 = vpow2.f32 %v309_v35 }
 0x2da   :  { %v392_v36 = vpop.eup %391 }
 0x2db   :  { %v314_v37 = vsel %vm504_vm7, %v392_v36, 0.0  ;;  %v311_v38 = vsel %vm293_vm8, %v392_v36, 0.0 }
 0x2dc   :  { %315 = vadd.xlane.f32.xlu1 %v314_v37  ;;  %312 = vadd.xlane.f32.xlu0 %v311_v38 }
 0x365   :  { %v316_v39 = vpop.xlane.xlu1 %315  ;;  %v313_v40 = vpop.xlane.xlu0 %312 }
 0x366   :  { %393 = vlog2.f32 %v316_v39 }
 0x367   :  { %395 = vlog2.f32 %v313_v40 }
 0x373   :  { %v394_v41 = vpop.eup %393 }
 0x374   :  { %v396_v42 = vpop.eup %395  ;;  %v321_v43 = vmul.f32 0.6931472, %v394_v41 }
 0x375   :  { %v318_v44 = vmul.f32 0.6931472, %v396_v42 }
 0x376   :  { %v322_v45 = vadd.f32 %v321_v43, %v306_v31 }
 0x377   :  { %v319_v46 = vadd.f32 %v318_v44, %v301_v32 }
 0x378   :  { %v324_v47 = vsub.f32 %v290_v28, %v322_v45 }
 0x379   :  { %v323_v48 = vsub.f32 %v290_v28, %v319_v46 }
 0x37a   :  { %v325_v49 = vsel %vm504_vm7, %v324_v47, 0.0 }
 0x37b   :  { %v326_v50 = vsel %vm293_vm8, %v323_v48, %v325_v49 }
 0x37c   :  { %327 = vst [vmem:[%s531_s5] sm:$0xff] %v326_v50 }
 0x37d   :  { %332 = vsyncpa [#allocation3], 1 }
 0x37e   :  { %333 = vsyncpa [#allocation5], 1 }

</bundles_post_ra>
